<compile_context>
chip_gen: v5e
topology: v5e:2x2
jax: 0.10.0
libtpu: 0.0.40
codegen_flags: <defaults>
</compile_context>

<pallas_src>
import functools

import jax
import jax.numpy as jnp
from jax import lax
from jax.experimental import pallas as pl
from jax.experimental.pallas import tpu as pltpu

_INV_SQRT2 = 0.7071067811865476
_RES_SCALE = 1.0 / 1.414  # faithful to the PyTorch "/ 1.414" (intentionally not 1/sqrt(2))


def _gelu_exact(x):
    # nn.GELU() default = exact erf-based GELU (f32 math).
    return 0.5 * x * (1.0 + lax.erf(x * _INV_SQRT2))


def _round_up(n, m):
    return (n + m - 1) // m * m


def _pad_2d(a, rows, cols, dtype):
    a = a.astype(dtype)
    if a.shape == (rows, cols):
        return a
    return jnp.zeros((rows, cols), dtype).at[: a.shape[0], : a.shape[1]].set(a)


def _vmem_limit_bytes():
    try:
        cap = int(pltpu.get_tpu_info().vmem_capacity_bytes)
        return max(32 * 1024 * 1024, int(cap * 0.85))
    except Exception:
        return 64 * 1024 * 1024  # conservative (fits v7x physical VMEM)


def _choose_batch_tiling(batch, tb_max=512, min_tiles=2):
    """Pad batch only to a multiple of 8; pick a tile so padding waste stays tiny and the
    grid has >= min_tiles iterations (lets v7x shard the parallel batch axis over 2 TCs)."""
    b8 = _round_up(batch, 8)
    if b8 <= 8:
        return b8, b8
    n_tiles = max(min_tiles, pl.cdiv(b8, tb_max))
    tb = _round_up(pl.cdiv(b8, n_tiles), 8)
    return tb, tb * n_tiles


def residual_block_kernel(x_ref, w1_ref, b1_ref, w2_ref, b2_ref, out_ref,
                          *, is_res: bool, same_channels: bool):
    x = x_ref[...]  # native (possibly bf16) dtype fed straight to the MXU

    # layer1: Linear + GELU (MXU matmul, f32 accumulate; bias is pre-padded f32)
    h1 = jnp.dot(x, w1_ref[...], preferred_element_type=jnp.float32)
    x1 = _gelu_exact(h1 + b1_ref[...])

    # layer2: Linear + GELU
    h2 = jnp.dot(x1.astype(w2_ref.dtype), w2_ref[...],
                 preferred_element_type=jnp.float32)
    x2 = _gelu_exact(h2 + b2_ref[...])

    if is_res:
        # Static Python branch: only the needed residual operand stays live.
        res = x.astype(jnp.float32) if same_channels else x1
        out = (res + x2) * _RES_SCALE
    else:
        out = x2

    out_ref[...] = out.astype(out_ref.dtype)


def prepare_residual_block_params(w1, b1, w2, b2, *, mxu_dtype=None):
    """Pad/cast parameters ONCE (at init), not per forward call.

    w1: [C_in, C_out]; b1: [C_out] or [1, C_out]; w2: [C_out, C_out]; b2: likewise.
    mxu_dtype: optional (e.g. jnp.bfloat16) to halve weight HBM bytes and use the fast
    bf16 MXU path; accumulation / bias / GELU math stays f32.
    """
    c_in, c_out = w1.shape
    cin_p, cout_p = _round_up(c_in, 128), _round_up(c_out, 128)
    wdt = jnp.dtype(mxu_dtype) if mxu_dtype is not None else jnp.dtype(w1.dtype)
    return dict(
        w1=_pad_2d(w1, cin_p, cout_p, wdt),
        b1=_pad_2d(jnp.reshape(b1, (1, c_out)), 1, cout_p, jnp.float32),
        w2=_pad_2d(w2, cout_p, cout_p, wdt),
        b2=_pad_2d(jnp.reshape(b2, (1, c_out)), 1, cout_p, jnp.float32),
        c_in=c_in, c_out=c_out, cin_p=cin_p, cout_p=cout_p, mxu_dtype=wdt,
    )


def residual_block(x, params, *, is_res: bool, tb_max: int = 512):
    """x: [B, C_in]; params: output of prepare_residual_block_params()."""
    B, c_in = x.shape
    assert c_in == params["c_in"], "channel mismatch vs. prepared params"
    c_out, cin_p, cout_p = params["c_out"], params["cin_p"], params["cout_p"]
    same_channels = (c_in == c_out)
    out_dtype = x.dtype

    tb, b_p = _choose_batch_tiling(B, tb_max)

    # Pad/cast x only when actually misaligned (rows to tile multiple, cols to 128,
    # MXU dtype).  Aligned inputs pass straight through with no HBM copy.
    xdt = params["mxu_dtype"]
    if B == b_p and c_in == cin_p and x.dtype == xdt:
        xp = x
    else:
        xp = _pad_2d(x, b_p, cin_p, xdt)

    kernel = functools.partial(residual_block_kernel,
                               is_res=is_res, same_channels=same_channels)

    w_item = jnp.dtype(xdt).itemsize
    o_item = jnp.dtype(out_dtype).itemsize
    flops = 2 * b_p * (cin_p * cout_p + cout_p * cout_p) + 8 * b_p * cout_p
    transcendentals = 2 * b_p * cout_p
    bytes_accessed = (w_item * b_p * cin_p + o_item * b_p * cout_p
                      + w_item * (cin_p * cout_p + cout_p * cout_p) + 4 * 2 * cout_p)
    cost = pl.CostEstimate(flops=int(flops), transcendentals=int(transcendentals),
                           bytes_accessed=int(bytes_accessed))
    vmem_limit = _vmem_limit_bytes()

    def _run(single_buffer_weights):
        # Constant-index resident operands never change between grid steps; single-buffer
        # them so f32 weights don't double their VMEM footprint (matters on v7x's 64 MiB).
        w_kwargs = ({"pipeline_mode": pl.Buffered(1)} if single_buffer_weights else {})
        return pl.pallas_call(
            kernel,
            out_shape=jax.ShapeDtypeStruct((b_p, cout_p), out_dtype),
            grid_spec=pltpu.PrefetchScalarGridSpec(
                num_scalar_prefetch=0,
                grid=(b_p // tb,),
                in_specs=[
                    pl.BlockSpec((tb, cin_p), lambda i: (i, 0)),                  # x tile
                    pl.BlockSpec((cin_p, cout_p), lambda i: (0, 0), **w_kwargs),  # W1
                    pl.BlockSpec((1, cout_p), lambda i: (0, 0), **w_kwargs),      # b1 (f32)
                    pl.BlockSpec((cout_p, cout_p), lambda i: (0, 0), **w_kwargs),  # W2
                    pl.BlockSpec((1, cout_p), lambda i: (0, 0), **w_kwargs),      # b2 (f32)
                ],
                out_specs=pl.BlockSpec((tb, cout_p), lambda i: (i, 0)),
            ),
            compiler_params=pltpu.CompilerParams(
                dimension_semantics=("parallel",),
                vmem_limit_bytes=vmem_limit),
            cost_estimate=cost,
        )(xp, params["w1"], params["b1"], params["w2"], params["b2"])

    try:
        out_full = _run(True)
    except Exception:
        # Fallback if Buffered(1) is unsupported in this JAX version.
        out_full = _run(False)

    if b_p == B and cout_p == c_out:
        return out_full
    return out_full[:B, :c_out]


def residual_block_ref(x, w1, b1, w2, b2, *, is_res: bool):
    x1 = jax.nn.gelu(x @ w1 + jnp.reshape(b1, (1, -1)), approximate=False)
    x2 = jax.nn.gelu(x1 @ w2 + jnp.reshape(b2, (1, -1)), approximate=False)
    if is_res:
        res = x if x.shape[-1] == w1.shape[1] else x1
        return (res + x2) / 1.414
    return x2


if __name__ == "__main__":
    key = jax.random.PRNGKey(0)
    kx, k1, k2, k3, k4 = jax.random.split(key, 5)

    # --- case 1: is_res=True, same channels (x + x2 residual path) ----------
    B, C_IN, C_OUT = 16, 32, 32
    x = jax.random.normal(kx, (B, C_IN), dtype=jnp.float32)
    w1 = jax.random.normal(k1, (C_IN, C_OUT), dtype=jnp.float32) * (1.0 / jnp.sqrt(C_IN))
    b1 = jax.random.normal(k2, (1, C_OUT), dtype=jnp.float32) * 0.01
    w2 = jax.random.normal(k3, (C_OUT, C_OUT), dtype=jnp.float32) * (1.0 / jnp.sqrt(C_OUT))
    b2 = jax.random.normal(k4, (1, C_OUT), dtype=jnp.float32) * 0.01

    params = prepare_residual_block_params(w1, b1, w2, b2)  # padded once, reused
    out = jax.block_until_ready(residual_block(x, params, is_res=True))
    ref = residual_block_ref(x, w1, b1, w2, b2, is_res=True)
    assert out.shape == (B, C_OUT)
    assert jnp.allclose(out, ref, atol=1e-5, rtol=1e-5), "mismatch (is_res, same ch)"

    # --- case 2: is_res=True, different channels (x1 + x2 residual path) ----
    C_OUT2 = 48
    w1b = jax.random.normal(k1, (C_IN, C_OUT2), dtype=jnp.float32) * (1.0 / jnp.sqrt(C_IN))
    b1b = jax.random.normal(k2, (1, C_OUT2), dtype=jnp.float32) * 0.01
    w2b = jax.random.normal(k3, (C_OUT2, C_OUT2), dtype=jnp.float32) * (1.0 / jnp.sqrt(C_OUT2))
    b2b = jax.random.normal(k4, (1, C_OUT2), dtype=jnp.float32) * 0.01

    params_b = prepare_residual_block_params(w1b, b1b, w2b, b2b)
    out2 = jax.block_until_ready(residual_block(x, params_b, is_res=True))
    ref2 = residual_block_ref(x, w1b, b1b, w2b, b2b, is_res=True)
    assert out2.shape == (B, C_OUT2)
    assert jnp.allclose(out2, ref2, atol=1e-5, rtol=1e-5), "mismatch (is_res, diff ch)"

    # --- case 3: is_res=False -----------------------------------------------
    out3 = jax.block_until_ready(residual_block(x, params, is_res=False))
    ref3 = residual_block_ref(x, w1, b1, w2, b2, is_res=False)
    assert jnp.allclose(out3, ref3, atol=1e-5, rtol=1e-5), "mismatch (no res)"

    # --- case 4: awkward batch size exercises the 8-row padding path --------
    B2 = 13
    x4 = jax.random.normal(kx, (B2, C_IN), dtype=jnp.float32)
    out4 = jax.block_until_ready(residual_block(x4, params, is_res=True))
    ref4 = residual_block_ref(x4, w1, b1, w2, b2, is_res=True)
    assert out4.shape == (B2, C_OUT)
    assert jnp.allclose(out4, ref4, atol=1e-5, rtol=1e-5), "mismatch (padded batch)"

    print("KERNEL_OK")
</pallas_src>

<mosaic_0001>
module attributes {stable_mosaic.version = 11 : i64} {
  func.func @residual_block_kernel(%arg0: i32, %arg1: memref<8x128xf32, #tpu.memory_space<vmem>>, %arg2: memref<128x128xf32, #tpu.memory_space<vmem>>, %arg3: memref<1x128xf32, #tpu.memory_space<vmem>>, %arg4: memref<128x128xf32, #tpu.memory_space<vmem>>, %arg5: memref<1x128xf32, #tpu.memory_space<vmem>>, %arg6: memref<8x128xf32, #tpu.memory_space<vmem>>) attributes {dimension_semantics = [#tpu.dimension_semantics<parallel>], iteration_bounds = array<i64: 2>, scalar_prefetch = 0 : i64, scratch_operands = 0 : i64, tpu.core_type = #tpu.core_type<tc>, window_params = [{transform_indices = @transform_0, window_bounds = array<i64: 8, 128>}, {pipeline_mode = #tpu.pipeline_mode<synchronous>, transform_indices = @transform_1, window_bounds = array<i64: 128, 128>}, {pipeline_mode = #tpu.pipeline_mode<synchronous>, transform_indices = @transform_2, window_bounds = array<i64: 1, 128>}, {pipeline_mode = #tpu.pipeline_mode<synchronous>, transform_indices = @transform_3, window_bounds = array<i64: 128, 128>}, {pipeline_mode = #tpu.pipeline_mode<synchronous>, transform_indices = @transform_4, window_bounds = array<i64: 1, 128>}, {transform_indices = @transform_5, window_bounds = array<i64: 8, 128>}]} {
    %c0 = arith.constant 0 : index
    %c0_0 = arith.constant 0 : index
    %0 = vector.load %arg1[%c0, %c0_0] : memref<8x128xf32, #tpu.memory_space<vmem>>, vector<8x128xf32>
    %c0_1 = arith.constant 0 : index
    %c0_2 = arith.constant 0 : index
    %1 = vector.load %arg2[%c0_1, %c0_2] : memref<128x128xf32, #tpu.memory_space<vmem>>, vector<128x128xf32>
    %cst = arith.constant dense<0.000000e+00> : vector<8x128xf32>
    %2 = tpu.matmul %0, %1, %cst {dimension_numbers = #tpu.dot_dimension_numbers<[1], [0], [0], [1], [0, 0, 1, 1], [], []>} : vector<8x128xf32>, vector<128x128xf32>, vector<8x128xf32> -> vector<8x128xf32>
    %c0_3 = arith.constant 0 : index
    %c0_4 = arith.constant 0 : index
    %3 = vector.load %arg3[%c0_3, %c0_4] : memref<1x128xf32, #tpu.memory_space<vmem>>, vector<1x128xf32>
    %4 = vector.broadcast %3 : vector<1x128xf32> to vector<8x128xf32>
    %5 = arith.addf %2, %4 : vector<8x128xf32>
    %cst_5 = arith.constant 5.000000e-01 : f32
    %6 = vector.broadcast %cst_5 : f32 to vector<8x128xf32>
    %7 = arith.mulf %6, %5 : vector<8x128xf32>
    %cst_6 = arith.constant 0.707106769 : f32
    %8 = vector.broadcast %cst_6 : f32 to vector<8x128xf32>
    %9 = arith.mulf %5, %8 : vector<8x128xf32>
    %10 = math.erf %9 : vector<8x128xf32>
    %cst_7 = arith.constant 1.000000e+00 : f32
    %11 = vector.broadcast %cst_7 : f32 to vector<8x128xf32>
    %12 = arith.addf %11, %10 : vector<8x128xf32>
    %13 = arith.mulf %7, %12 : vector<8x128xf32>
    %c0_8 = arith.constant 0 : index
    %c0_9 = arith.constant 0 : index
    %14 = vector.load %arg4[%c0_8, %c0_9] : memref<128x128xf32, #tpu.memory_space<vmem>>, vector<128x128xf32>
    %cst_10 = arith.constant dense<0.000000e+00> : vector<8x128xf32>
    %15 = tpu.matmul %13, %14, %cst_10 {dimension_numbers = #tpu.dot_dimension_numbers<[1], [0], [0], [1], [0, 0, 1, 1], [], []>} : vector<8x128xf32>, vector<128x128xf32>, vector<8x128xf32> -> vector<8x128xf32>
    %c0_11 = arith.constant 0 : index
    %c0_12 = arith.constant 0 : index
    %16 = vector.load %arg5[%c0_11, %c0_12] : memref<1x128xf32, #tpu.memory_space<vmem>>, vector<1x128xf32>
    %17 = vector.broadcast %16 : vector<1x128xf32> to vector<8x128xf32>
    %18 = arith.addf %15, %17 : vector<8x128xf32>
    %cst_13 = arith.constant 5.000000e-01 : f32
    %19 = vector.broadcast %cst_13 : f32 to vector<8x128xf32>
    %20 = arith.mulf %19, %18 : vector<8x128xf32>
    %cst_14 = arith.constant 0.707106769 : f32
    %21 = vector.broadcast %cst_14 : f32 to vector<8x128xf32>
    %22 = arith.mulf %18, %21 : vector<8x128xf32>
    %23 = math.erf %22 : vector<8x128xf32>
    %cst_15 = arith.constant 1.000000e+00 : f32
    %24 = vector.broadcast %cst_15 : f32 to vector<8x128xf32>
    %25 = arith.addf %24, %23 : vector<8x128xf32>
    %26 = arith.mulf %20, %25 : vector<8x128xf32>
    %27 = arith.addf %0, %26 : vector<8x128xf32>
    %cst_16 = arith.constant 0.70721358 : f32
    %28 = vector.broadcast %cst_16 : f32 to vector<8x128xf32>
    %29 = arith.mulf %27, %28 : vector<8x128xf32>
    %c0_17 = arith.constant 0 : index
    %c0_18 = arith.constant 0 : index
    %30 = vector.load %arg6[%c0_17, %c0_18] : memref<8x128xf32, #tpu.memory_space<vmem>>, vector<8x128xf32>
    tpu.vector_store %arg6[%c0_17, %c0_18], %29 {strides = array<i32>} : memref<8x128xf32, #tpu.memory_space<vmem>>, vector<8x128xf32>,
    return
  }
  func.func @transform_0(%arg0: i32) -> (i32, i32) {
    %c0_i32 = arith.constant 0 : i32
    %c0_i32_0 = arith.constant 0 : i32
    return %arg0, %c0_i32 : i32, i32
  }
  func.func @transform_1(%arg0: i32) -> (i32, i32) {
    %c0_i32 = arith.constant 0 : i32
    %c0_i32_0 = arith.constant 0 : i32
    %c0_i32_1 = arith.constant 0 : i32
    return %c0_i32, %c0_i32_0 : i32, i32
  }
  func.func @transform_2(%arg0: i32) -> (i32, i32) {
    %c0_i32 = arith.constant 0 : i32
    %c0_i32_0 = arith.constant 0 : i32
    %c0_i32_1 = arith.constant 0 : i32
    return %c0_i32, %c0_i32_0 : i32, i32
  }
  func.func @transform_3(%arg0: i32) -> (i32, i32) {
    %c0_i32 = arith.constant 0 : i32
    %c0_i32_0 = arith.constant 0 : i32
    %c0_i32_1 = arith.constant 0 : i32
    return %c0_i32, %c0_i32_0 : i32, i32
  }
  func.func @transform_4(%arg0: i32) -> (i32, i32) {
    %c0_i32 = arith.constant 0 : i32
    %c0_i32_0 = arith.constant 0 : i32
    %c0_i32_1 = arith.constant 0 : i32
    return %c0_i32, %c0_i32_0 : i32, i32
  }
  func.func @transform_5(%arg0: i32) -> (i32, i32) {
    %c0_i32 = arith.constant 0 : i32
    %c0_i32_0 = arith.constant 0 : i32
    return %arg0, %c0_i32 : i32, i32
  }
}

module attributes {stable_mosaic.version = 11 : i64} {
  func.func @residual_block_kernel(%arg0: i32, %arg1: memref<8x128xf32, #tpu.memory_space<vmem>>, %arg2: memref<128x128xf32, #tpu.memory_space<vmem>>, %arg3: memref<1x128xf32, #tpu.memory_space<vmem>>, %arg4: memref<128x128xf32, #tpu.memory_space<vmem>>, %arg5: memref<1x128xf32, #tpu.memory_space<vmem>>, %arg6: memref<8x128xf32, #tpu.memory_space<vmem>>) attributes {dimension_semantics = [#tpu.dimension_semantics<parallel>], iteration_bounds = array<i64: 2>, scalar_prefetch = 0 : i64, scratch_operands = 0 : i64, tpu.core_type = #tpu.core_type<tc>, window_params = [{transform_indices = @transform_0, window_bounds = array<i64: 8, 128>}, {pipeline_mode = #tpu.pipeline_mode<synchronous>, transform_indices = @transform_1, window_bounds = array<i64: 128, 128>}, {pipeline_mode = #tpu.pipeline_mode<synchronous>, transform_indices = @transform_2, window_bounds = array<i64: 1, 128>}, {pipeline_mode = #tpu.pipeline_mode<synchronous>, transform_indices = @transform_3, window_bounds = array<i64: 128, 128>}, {pipeline_mode = #tpu.pipeline_mode<synchronous>, transform_indices = @transform_4, window_bounds = array<i64: 1, 128>}, {transform_indices = @transform_5, window_bounds = array<i64: 8, 128>}]} {
    %c0 = arith.constant 0 : index
    %c0_0 = arith.constant 0 : index
    %0 = vector.load %arg1[%c0, %c0_0] : memref<8x128xf32, #tpu.memory_space<vmem>>, vector<8x128xf32>
    %c0_1 = arith.constant 0 : index
    %c0_2 = arith.constant 0 : index
    %1 = vector.load %arg2[%c0_1, %c0_2] : memref<128x128xf32, #tpu.memory_space<vmem>>, vector<128x128xf32>
    %cst = arith.constant dense<0.000000e+00> : vector<8x128xf32>
    %2 = tpu.matmul %0, %1, %cst {dimension_numbers = #tpu.dot_dimension_numbers<[1], [0], [0], [1], [0, 0, 1, 1], [], []>} : vector<8x128xf32>, vector<128x128xf32>, vector<8x128xf32> -> vector<8x128xf32>
    %c0_3 = arith.constant 0 : index
    %c0_4 = arith.constant 0 : index
    %3 = vector.load %arg3[%c0_3, %c0_4] : memref<1x128xf32, #tpu.memory_space<vmem>>, vector<1x128xf32>
    %4 = vector.broadcast %3 : vector<1x128xf32> to vector<8x128xf32>
    %5 = arith.addf %2, %4 : vector<8x128xf32>
    %cst_5 = arith.constant 5.000000e-01 : f32
    %6 = vector.broadcast %cst_5 : f32 to vector<8x128xf32>
    %7 = arith.mulf %6, %5 : vector<8x128xf32>
    %cst_6 = arith.constant 0.707106769 : f32
    %8 = vector.broadcast %cst_6 : f32 to vector<8x128xf32>
    %9 = arith.mulf %5, %8 : vector<8x128xf32>
    %10 = math.erf %9 : vector<8x128xf32>
    %cst_7 = arith.constant 1.000000e+00 : f32
    %11 = vector.broadcast %cst_7 : f32 to vector<8x128xf32>
    %12 = arith.addf %11, %10 : vector<8x128xf32>
    %13 = arith.mulf %7, %12 : vector<8x128xf32>
    %c0_8 = arith.constant 0 : index
    %c0_9 = arith.constant 0 : index
    %14 = vector.load %arg4[%c0_8, %c0_9] : memref<128x128xf32, #tpu.memory_space<vmem>>, vector<128x128xf32>
    %cst_10 = arith.constant dense<0.000000e+00> : vector<8x128xf32>
    %15 = tpu.matmul %13, %14, %cst_10 {dimension_numbers = #tpu.dot_dimension_numbers<[1], [0], [0], [1], [0, 0, 1, 1], [], []>} : vector<8x128xf32>, vector<128x128xf32>, vector<8x128xf32> -> vector<8x128xf32>
    %c0_11 = arith.constant 0 : index
    %c0_12 = arith.constant 0 : index
    %16 = vector.load %arg5[%c0_11, %c0_12] : memref<1x128xf32, #tpu.memory_space<vmem>>, vector<1x128xf32>
    %17 = vector.broadcast %16 : vector<1x128xf32> to vector<8x128xf32>
    %18 = arith.addf %15, %17 : vector<8x128xf32>
    %cst_13 = arith.constant 5.000000e-01 : f32
    %19 = vector.broadcast %cst_13 : f32 to vector<8x128xf32>
    %20 = arith.mulf %19, %18 : vector<8x128xf32>
    %cst_14 = arith.constant 0.707106769 : f32
    %21 = vector.broadcast %cst_14 : f32 to vector<8x128xf32>
    %22 = arith.mulf %18, %21 : vector<8x128xf32>
    %23 = math.erf %22 : vector<8x128xf32>
    %cst_15 = arith.constant 1.000000e+00 : f32
    %24 = vector.broadcast %cst_15 : f32 to vector<8x128xf32>
    %25 = arith.addf %24, %23 : vector<8x128xf32>
    %26 = arith.mulf %20, %25 : vector<8x128xf32>
    %27 = arith.addf %0, %26 : vector<8x128xf32>
    %cst_16 = arith.constant 0.70721358 : f32
    %28 = vector.broadcast %cst_16 : f32 to vector<8x128xf32>
    %29 = arith.mulf %27, %28 : vector<8x128xf32>
    %c0_17 = arith.constant 0 : index
    %c0_18 = arith.constant 0 : index
    %30 = vector.load %arg6[%c0_17, %c0_18] : memref<8x128xf32, #tpu.memory_space<vmem>>, vector<8x128xf32>
    tpu.vector_store %arg6[%c0_17, %c0_18], %29 {strides = array<i32>} : memref<8x128xf32, #tpu.memory_space<vmem>>, vector<8x128xf32>,
    return
  }
  func.func @transform_0(%arg0: i32) -> (i32, i32) {
    %c0_i32 = arith.constant 0 : i32
    %c0_i32_0 = arith.constant 0 : i32
    return %arg0, %c0_i32 : i32, i32
  }
  func.func @transform_1(%arg0: i32) -> (i32, i32) {
    %c0_i32 = arith.constant 0 : i32
    %c0_i32_0 = arith.constant 0 : i32
    %c0_i32_1 = arith.constant 0 : i32
    return %c0_i32, %c0_i32_0 : i32, i32
  }
  func.func @transform_2(%arg0: i32) -> (i32, i32) {
    %c0_i32 = arith.constant 0 : i32
    %c0_i32_0 = arith.constant 0 : i32
    %c0_i32_1 = arith.constant 0 : i32
    return %c0_i32, %c0_i32_0 : i32, i32
  }
  func.func @transform_3(%arg0: i32) -> (i32, i32) {
    %c0_i32 = arith.constant 0 : i32
    %c0_i32_0 = arith.constant 0 : i32
    %c0_i32_1 = arith.constant 0 : i32
    return %c0_i32, %c0_i32_0 : i32, i32
  }
  func.func @transform_4(%arg0: i32) -> (i32, i32) {
    %c0_i32 = arith.constant 0 : i32
    %c0_i32_0 = arith.constant 0 : i32
    %c0_i32_1 = arith.constant 0 : i32
    return %c0_i32, %c0_i32_0 : i32, i32
  }
  func.func @transform_5(%arg0: i32) -> (i32, i32) {
    %c0_i32 = arith.constant 0 : i32
    %c0_i32_0 = arith.constant 0 : i32
    return %arg0, %c0_i32 : i32, i32
  }
}

</mosaic_0001>

<bundles_post_ra>
// kernel: tpu_custom_call.1
= control target key start
LH: loop header
LB: loop body
LE: loop exit
PB: predicated region body
PF: predicated region fallthrough
CT: control target
= control target key end

     0   :  { %10 = vsyncpa [#allocation3], 0  ;;  %s1003_s0 = inlined_call_operand.hbm [shape: f32[16,128], index: 0, kind: input, shape index: {}]   ;;  %s1004_s1 = inlined_call_operand.hbm [shape: f32[128,128], index: 1, kind: input, shape index: {}]   ;;  %s1005_s2 = inlined_call_operand.vmem [shape: f32[1,128], index: 2, kind: input, shape index: {}]   ;;  %s1006_s3 = inlined_call_operand.hbm [shape: f32[128,128], index: 3, kind: input, shape index: {}]   ;;  %s1007_s4 = inlined_call_operand.vmem [shape: f32[1,128], index: 4, kind: input, shape index: {}]   ;;  %s1008_s5 = inlined_call_operand.hbm [shape: f32[16,128], index: 5, kind: output, shape index: {}]  }
   0x1   :  { %12 = vsyncpa [#allocation3 + $0x1], 0 }
   0x2   :  { %13 = vsyncpa [#allocation6], 0 }
   0x3   :  { %14 = vsyncpa [#allocation4], 0 }
   0x4   :  { %16 = vsyncpa [#allocation4 + $0x1], 0  ;;  %s841_s18 = smov 0   ;;  %s843_s19 = smov 0  }
   0x5   :  { %s845_s20 = smov 0   ;;  %s847_s21 = smov 0  }
   0x6 LB: > { %s174_s24 = sshll.u32 %s1004_s1, 4  ;;  %s865_s25 = sadd.s32 4294967295, %s805_s21   ;;  %s805_s21 = sphi %s847_s21, %s1019_s21   ;;  %s801_s20 = sphi %s845_s20, %s1018_s20   ;;  %s797_s19 = sphi %s843_s19, %s1017_s19   ;;  %s793_s18 = sphi %s841_s18, %s1016_s18   ;;  %s175_s24 = int_to_ptr.hbm [resolvable:$true] %s174_s24 }
   0x7   : > { %p553_p0 = scmp.ge.s32.totalorder %s805_s21, 1  ;;  %p43_p1 = scmp.eq.s32.totalorder %s865_s25, 0 }
   0x8   : > { %p163_p2 = scmp.lt.s32.totalorder %s805_s21, 3  ;;  %s807_s27 = smov [#allocation5]  }
   0x9   : > { %s176_s28 = sshll.u32 %s807_s27, 4  ;;  %s191_s6 = sshll.u32 %s1006_s3, 4  ;;  %s177_s28 = int_to_ptr.vmem [resolvable:$true] %s176_s28  ;;  %s192_s6 = int_to_ptr.hbm [resolvable:$true] %s191_s6 }
   0xa   : > { %p870_p3 = pnand %p553_p0, %p163_p2  ;;  %s808_s7 = smov [#allocation7]  }
   0xb   : > { %s193_s8 = sshll.u32 %s808_s7, 4  ;;  %s809_s9 = smov 128   ;;  %s194_s8 = int_to_ptr.vmem [resolvable:$true] %s193_s8 }
   0xc   : > { %p582_p4 = pneg %p870_p3  ;;  %s810_s10 = smov 8  }
   0xd   : > { %s552_s11 = sadd.s32 4294967294, %s805_s21   ;;  %s884_s12 = sadd.s32 1, %s805_s21  }
   0xe   : > { %p583_p6 = pnand %p582_p4, %p43_p1  ;;  %s26_s13 = ssub.s32 %s805_s21, %s884_s12 }
   0xf   : > { %s29_s14 = sadd.s32 1, %s801_s20  ;;  %p27_p7 = scmp.eq.s32.totalorder %s26_s13, 0 }
  0x10   : > { %585 = dma.hbm_to_vmem [thread:$0]  (!%p583_p6), %s175_s24, 2048, %s177_s28, [#allocation6], %s809_s9, %s809_s9, %s810_s10  }
  0x11   : > { %588 = dma.hbm_to_vmem [thread:$0]  (!%p583_p6), %s192_s6, 2048, %s194_s8, [#allocation6], %s809_s9, %s809_s9, %s810_s10  }
  0x12   : > { %p36_p8 = scmp.ne.s32.totalorder %s801_s20, %s797_s19  ;;  %p37_p9 = scmp.eq.s32.totalorder %s805_s21, 0 }
  0x13   : > { %p42_p10 = scmp.ne.s32.totalorder %s797_s19, %s793_s18  ;;  %p150_p13 = scmp.eq.s32.totalorder %s865_s25, 1 }
  0x14   : > { %s895_s15 = scalar_select %p27_p7, %s801_s20, %s29_s14  }
  0x15   : > { %p897_p11 = por %p37_p9, %p36_p8  ;;  %p903_p12 = por %p43_p1, %p42_p10 }
  0x16   : > { %p156_p0 = scmp.eq.s32.totalorder %s552_s11, 1  ;;  %p599_p2 = scmp.lt.s32.totalorder %s805_s21, 2 }
  0x17   : > { %s210_s22 = sand.u32 1, %s801_s20   ;;  %p910_p4 = por %p150_p13, %p36_p8 }
  0x18   : > { %p914_p6 = por %p156_p0, %p42_p10  ;;  %s557_s27 = sshll.u32 %s210_s22, 3 }
  0x19   : > { %s558_s28 = sshll.u32 %s805_s21, 3  ;;  %s214_s7 = scalar_lea.vmem [#allocation2], %s557_s27 }
  0x1a   : > { %s218_s6 = scalar_lea.hbm %s1003_s0, %s558_s28  ;;  %s222_s8 = sshll.u32 %s214_s7, 4  ;;  %s223_s8 = int_to_ptr.vmem [resolvable:$true] %s222_s8 }
  0x1b   : > { %s220_s9 = sshll.u32 %s218_s6, 4  ;;  %p924_p7 = pnand %p599_p2, %p897_p11  ;;  %s221_s9 = int_to_ptr.hbm [resolvable:$true] %s220_s9 }
  0x1c   : > { %s211_s11 = scalar_lea.sflag [#allocation3], %s210_s22  ;;  %s705_s13 = sshra.s32 %s221_s9, 4  ;;  %s706_s13 = int_to_ptr.hbm [resolvable:$true] %s705_s13 }
  0x1d   : > { %s707_s14 = scalar_lea.hbm %s706_s13, 8  ;;  %p709_p9 = pneg %p924_p7 }
  0x1e   : > { %p708_p8 = scmp.ne.s32.totalorder %s706_s13, %s707_s14  ;;  %s712_s29 = scalar_lea.hbm %s1003_s0, 16 }
  0x1f   : > { %p713_p11 = scmp.lt.s32.totalorder %s706_s13, %s1003_s0  ;;  %p714_p0 = scmp.lt.s32.totalorder %s712_s29, %s707_s14 }
  0x20   : > { %p710_p10 = pnand %p709_p9, %p708_p8 }
  0x21   : > { %p715_p2 = por %p714_p0, %p713_p11 }
  0x22   : > { %p711_p13 = pneg %p710_p10 }
  0x24   : > { %p716_p5 = pnand %p715_p2, %p711_p13 }
  0x26   : > { %719 = shalt.err (!%p716_p5)
}
  0x27   : > { %592 = dma.hbm_to_vmem [thread:$0]  (!%p924_p7), %s221_s9, 128, %s223_s8, %s211_s11  }
  0x28   : > { %231 = sbr.rel (%p870_p3) target bundleno = 445 (0x1bd), region = 40  ;;  %s941_s22 = sand.u32 (!%p870_p3), 1, %s797_s19  }
  0x29   : > { %s560_s6 = sshll.u32 (!%p870_p3), %s941_s22, 3  ;;  %s234_s7 = scalar_lea.sflag (!%p870_p3), [#allocation3], %s941_s22 }
  0x2a   : > { %s947_s13 = scalar_lea.vmem (!%p870_p3), [#allocation2], %s560_s6 }
  0x2d   : > { %780 = dma.done.wait (%p903_p12), %s234_s7, 128  }
  0x2e   : > { %782 = vsyncadd (%p903_p12), %s234_s7, 4294967168 }
  0x2f   : > { %784 = dma.done.wait (%p43_p1), [#allocation6], 4096  }
  0x30   : > { %786 = vsyncadd (%p43_p1), [#allocation6], 4294963200  ;;  %v291_v0 = vld [vmem:[#allocation5 + $0x78] sm:$0xff]  ;;  %v290_v1 = vld [vmem:[#allocation5 + $0x70] sm:$0xff]  ;;  %s567_s10 = sshll.u32 %s865_s25, 3  ;;  %s274_s28 = scalar_lea.vmem [#allocation8], %s560_s6 }
  0x31   : > { %296 = vmatpush.msra.mxu0 %v291_v0  ;;  %v289_v2 = vld [vmem:[#allocation5 + $0x68] sm:$0xff]  ;;  %v288_v3 = vld [vmem:[#allocation5 + $0x60] sm:$0xff]  ;;  %v287_v4 = vld [vmem:[#allocation5 + $0x58] sm:$0xff]  ;;  %s458_s27 = scalar_lea.hbm %s1008_s5, %s567_s10  ;;  %s460_s29 = sshll.u32 %s274_s28, 4  ;;  %s461_s29 = int_to_ptr.vmem [resolvable:$true] %s460_s29 }
  0x32   : > { %v286_v5 = vld [vmem:[#allocation5 + $0x50] sm:$0xff]  ;;  %v285_v6 = vld [vmem:[#allocation5 + $0x48] sm:$0xff]  ;;  %v284_v7 = vld [vmem:[#allocation5 + $0x40] sm:$0xff]  ;;  %s462_s30 = sshll.u32 %s458_s27, 4  ;;  %s448_s25 = scalar_lea.sflag [#allocation4], %s941_s22  ;;  %s463_s30 = int_to_ptr.hbm [resolvable:$true] %s462_s30 }
  0x33   : > { %297 = vmatpush.msra.mxu0 %v290_v1  ;;  %v283_v8 = vld [vmem:[#allocation5 + $0x38] sm:$0xff]  ;;  %v282_v9 = vld [vmem:[#allocation5 + $0x30] sm:$0xff]  ;;  %v281_v10 = vld [vmem:[#allocation5 + $0x28] sm:$0xff]  ;;  %s749_s16 = sshra.s32 %s463_s30, 4  ;;  %s755_s6 = scalar_lea.hbm %s1008_s5, 16  ;;  %s750_s16 = int_to_ptr.hbm [resolvable:$true] %s749_s16 }
  0x34   : > { %v280_v11 = vld [vmem:[#allocation5 + $0x20] sm:$0xff]  ;;  %v279_v12 = vld [vmem:[#allocation5 + $0x18] sm:$0xff]  ;;  %v278_v13 = vld [vmem:[#allocation5 + $0x10] sm:$0xff]  ;;  %s751_s7 = scalar_lea.hbm %s750_s16, 8  ;;  %p756_p12 = scmp.lt.s32.totalorder %s750_s16, %s1008_s5 }
  0x35   : > { %298 = vmatpush.msra.mxu0 %v289_v2  ;;  %v277_v14 = vld [vmem:[#allocation5 + $0x8] sm:$0xff]  ;;  %v276_v15 = vld [vmem:[#allocation5] sm:$0xff]  ;;  %v958_v16 = vld [vmem:[%s947_s13] sm:$0xff]  ;;  %p752_p1 = scmp.ne.s32.totalorder %s750_s16, %s751_s7  ;;  %p757_p7 = scmp.lt.s32.totalorder %s755_s6, %s751_s7 }
  0x36   : > { %v375_v17 = vld [vmem:[#allocation7 + $0x78] sm:$0xff]  ;;  %v374_v18 = vld [vmem:[#allocation7 + $0x70] sm:$0xff]  ;;  %v373_v19 = vld [vmem:[#allocation7 + $0x68] sm:$0xff] }
  0x37   : > { %299 = vmatpush.msra.mxu0 %v288_v3  ;;  %380 = vmatpush.msra.mxu1 %v375_v17  ;;  %v372_v20 = vld [vmem:[#allocation7 + $0x60] sm:$0xff]  ;;  %v639_v21 = vld [vmem:[%s1005_s2] ss:$0 sm:$0xff]  ;;  %v371_v22 = vld [vmem:[#allocation7 + $0x58] sm:$0xff]  ;;  %p753_p3 = pnand %p752_p1, %p910_p4  ;;  %p758_p8 = por %p757_p7, %p756_p12 }
  0x38   : > { %v370_v23 = vld [vmem:[#allocation7 + $0x50] sm:$0xff]  ;;  %v369_v25 = vld [vmem:[#allocation7 + $0x48] sm:$0xff]  ;;  %v368_v27 = vld [vmem:[#allocation7 + $0x40] sm:$0xff] }
  0x39   : > { %300 = vmatpush.msra.mxu0 %v287_v4  ;;  %381 = vmatpush.msra.mxu1 %v374_v18  ;;  %v367_v29 = vld [vmem:[#allocation7 + $0x38] sm:$0xff]  ;;  %v366_v31 = vld [vmem:[#allocation7 + $0x30] sm:$0xff]  ;;  %v365_v33 = vld [vmem:[#allocation7 + $0x28] sm:$0xff]  ;;  %p754_p5 = pneg %p753_p3 }
  0x3a   : > { %v364_v36 = vld [vmem:[#allocation7 + $0x20] sm:$0xff]  ;;  %v363_v39 = vld [vmem:[#allocation7 + $0x18] sm:$0xff]  ;;  %v362_v42 = vld [vmem:[#allocation7 + $0x10] sm:$0xff] }
  0x3b   : > { %301 = vmatpush.msra.mxu0 %v286_v5  ;;  %382 = vmatpush.msra.mxu1 %v373_v19  ;;  %v361_v45 = vld [vmem:[#allocation7 + $0x8] sm:$0xff]  ;;  %v360_v47 = vld [vmem:[#allocation7] sm:$0xff]  ;;  %p759_p9 = pnand %p758_p8, %p754_p5 }
  0x3d   : > { %302 = vmatpush.msra.mxu0 %v285_v6  ;;  %383 = vmatpush.msra.mxu1 %v372_v20 }
  0x3f   : > { %303 = vmatpush.msra.mxu0 %v284_v7  ;;  %384 = vmatpush.msra.mxu1 %v371_v22 }
  0x41   : > { %304 = vmatpush.msra.mxu0 %v283_v8  ;;  %385 = vmatpush.msra.mxu1 %v370_v23 }
  0x43   : > { %305 = vmatpush.msra.mxu0 %v282_v9  ;;  %386 = vmatpush.msra.mxu1 %v369_v25 }
  0x45   : > { %306 = vmatpush.msra.mxu0 %v281_v10  ;;  %387 = vmatpush.msra.mxu1 %v368_v27 }
  0x47   : > { %307 = vmatpush.msra.mxu0 %v280_v11  ;;  %388 = vmatpush.msra.mxu1 %v367_v29  ;;  %v640_v11 = vld [vmem:[%s1007_s4] ss:$0 sm:$0xff] }
  0x49   : > { %308 = vmatpush.msra.mxu0 %v279_v12  ;;  %389 = vmatpush.msra.mxu1 %v366_v31 }
  0x4b   : > { %309 = vmatpush.msra.mxu0 %v278_v13  ;;  %390 = vmatpush.msra.mxu1 %v365_v33 }
  0x4d   : > { %310 = vmatpush.msra.mxu0 %v277_v14  ;;  %391 = vmatpush.msra.mxu1 %v364_v36 }
  0x4f   : > { %311 = vmatpush.msra.mxu0 %v276_v15  ;;  %392 = vmatpush.msra.mxu1 %v363_v39 }
  0x50   : > { %312 = vmatmul.f32.vlgmr.msra.gmra.mxu0 %v958_v16 }
  0x51   : > { %393 = vmatpush.msra.mxu1 %v362_v42 }
  0x53   : > { %394 = vmatpush.msra.mxu1 %v361_v45 }
  0x55   : > { %395 = vmatpush.msra.mxu1 %v360_v47 }
  0xcd   : > { %v313_v24 = vpop.f32.mrf.mxu0 }
  0xce   : > { %v314_v26 = vadd.f32 %v639_v21, %v313_v24 }
  0xd0   : > { %v317_v28 = vmul.f32 0.70710677, %v314_v26  ;;  %v316_v8 = vmul.f32 0.5, %v314_v26 }
  0xd2   : > { %v318_v30 = vmul.f32 %v317_v28, %v317_v28 }
  0xd4   : > { %v319_v32 = vmin.f32 %v318_v30, 16.0 }
  0xd6   : > { %v320_v34 = vmul.f32 2.1237322e-06, %v319_v32  ;;  %v331_v35 = vmul.f32 3.8918573e-05, %v319_v32 }
  0xd8   : > { %v321_v37 = vadd.f32 0.00028619796, %v320_v34  ;;  %v332_v38 = vadd.f32 0.001143296, %v331_v35 }
  0xda   : > { %v322_v40 = vmul.f32 %v321_v37, %v319_v32  ;;  %v333_v41 = vmul.f32 %v332_v38, %v319_v32 }
  0xdc   : > { %v334_v43 = vadd.f32 0.014752088, %v333_v41  ;;  %v323_v44 = vadd.f32 0.0036580483, %v322_v40 }
  0xde   : > { %v335_v46 = vmul.f32 %v334_v43, %v319_v32  ;;  %v324_v49 = vmul.f32 %v323_v44, %v319_v32 }
  0xe0   : > { %v336_v48 = vadd.f32 0.112945676, %v335_v46  ;;  %v325_v52 = vadd.f32 0.05243302, %v324_v49 }
  0xe2   : > { %v337_v50 = vmul.f32 %v336_v48, %v319_v32  ;;  %v326_v55 = vmul.f32 %v325_v52, %v319_v32 }
  0xe4   : > { %v338_v51 = vadd.f32 0.4994258, %v337_v50  ;;  %v327_v56 = vadd.f32 0.18741608, %v326_v55 }
  0xe6   : > { %v339_v53 = vmul.f32 %v338_v51, %v319_v32  ;;  %v328_v58 = vmul.f32 %v327_v56, %v319_v32 }
  0xe8   : > { %v340_v54 = vadd.f32 1.0, %v339_v53  ;;  %v329_v62 = vadd.f32 1.1283791, %v328_v58 }
  0xea   : > { %641 = vrcp.f32 %v340_v54  ;;  %v352_v61 = vand.u32 2147483648, %v340_v54  ;;  %v350_v0 = vand.u32 2147483647, %v340_v54  ;;  %vm346_vm1 = vweird.f32 %v340_v54 }
  0xeb   : > { %v330_v3 = vmul.f32 %v329_v62, %v317_v28 }
  0xec   : > { %v353_v2 = vor.u32 1.1754944e-38, %v352_v61  ;;  %vm351_vm3 = vcmp.eq.f32.partialorder %v350_v0, 8.507059e+37 }
  0xf0   : > { %v642_v57 = vpop.eup %641 }
  0xf1   : > { %v342_v59 = vmul.f32 %v642_v57, %v340_v54  ;;  %vm347_vm0 = vweird.f32 %v642_v57 }
  0xf2   : > { %vm348_vm2 = vmor %vm346_vm1, %vm347_vm0 }
  0xf3   : > { %v343_v60 = vsub.f32 1.0, %v342_v59 }
  0xf5   : > { %v344_v63 = vmul.f32 %v642_v57, %v343_v60 }
  0xf7   : > { %v345_v1 = vadd.f32 %v642_v57, %v344_v63 }
  0xf9   : > { %v349_v4 = vsel %vm348_vm2, %v642_v57, %v345_v1 }
  0xfa   : > { %v354_v5 = vsel %vm351_vm3, %v353_v2, %v349_v4 }
  0xfb   : > { %v355_v6 = vmul.f32 %v354_v5, %v330_v3 }
  0xfd   : > { %v564_v7 = vclamps-f32 %v355_v6, 1.0 }
  0xff   : > { %v358_v9 = vadd.f32 1.0, %v564_v7 }
 0x101   : > { %v359_v10 = vmul.f32 %v358_v9, %v316_v8 }
 0x103   : > { %396 = vmatmul.f32.vlgmr.msra.gmra.mxu1 %v359_v10 }
 0x180   : > { %v397_v12 = vpop.f32.mrf.mxu1 }
 0x181   : > { %v398_v13 = vadd.f32 %v640_v11, %v397_v12 }
 0x183   : > { %v401_v14 = vmul.f32 0.70710677, %v398_v13  ;;  %v400_v51 = vmul.f32 0.5, %v398_v13 }
 0x185   : > { %v402_v15 = vmul.f32 %v401_v14, %v401_v14 }
 0x187   : > { %v403_v17 = vmin.f32 %v402_v15, 16.0 }
 0x189   : > { %v404_v18 = vmul.f32 2.1237322e-06, %v403_v17  ;;  %v415_v19 = vmul.f32 3.8918573e-05, %v403_v17 }
 0x18b   : > { %v405_v20 = vadd.f32 0.00028619796, %v404_v18  ;;  %v416_v21 = vadd.f32 0.001143296, %v415_v19 }
 0x18d   : > { %v406_v22 = vmul.f32 %v405_v20, %v403_v17  ;;  %v417_v23 = vmul.f32 %v416_v21, %v403_v17 }
 0x18f   : > { %v418_v24 = vadd.f32 0.014752088, %v417_v23  ;;  %v407_v25 = vadd.f32 0.0036580483, %v406_v22 }
 0x191   : > { %v419_v26 = vmul.f32 %v418_v24, %v403_v17  ;;  %v408_v28 = vmul.f32 %v407_v25, %v403_v17 }
 0x193   : > { %v420_v27 = vadd.f32 0.112945676, %v419_v26  ;;  %v409_v31 = vadd.f32 0.05243302, %v408_v28 }
 0x195   : > { %v421_v29 = vmul.f32 %v420_v27, %v403_v17  ;;  %v410_v34 = vmul.f32 %v409_v31, %v403_v17 }
 0x197   : > { %v422_v30 = vadd.f32 0.4994258, %v421_v29  ;;  %v411_v35 = vadd.f32 0.18741608, %v410_v34 }
 0x199   : > { %v423_v32 = vmul.f32 %v422_v30, %v403_v17  ;;  %v412_v37 = vmul.f32 %v411_v35, %v403_v17 }
 0x19b   : > { %v424_v33 = vadd.f32 1.0, %v423_v32  ;;  %v413_v41 = vadd.f32 1.1283791, %v412_v37 }
 0x19d   : > { %643 = vrcp.f32 %v424_v33  ;;  %v436_v40 = vand.u32 2147483648, %v424_v33  ;;  %v434_v43 = vand.u32 2147483647, %v424_v33  ;;  %vm430_vm5 = vweird.f32 %v424_v33 }
 0x19e   : > { %v414_v46 = vmul.f32 %v413_v41, %v401_v14 }
 0x19f   : > { %v437_v45 = vor.u32 1.1754944e-38, %v436_v40  ;;  %vm435_vm7 = vcmp.eq.f32.partialorder %v434_v43, 8.507059e+37 }
 0x1a3   : > { %v644_v36 = vpop.eup %643 }
 0x1a4   : > { %v426_v38 = vmul.f32 %v644_v36, %v424_v33  ;;  %vm431_vm4 = vweird.f32 %v644_v36 }
 0x1a5   : > { %vm432_vm6 = vmor %vm430_vm5, %vm431_vm4 }
 0x1a6   : > { %v427_v39 = vsub.f32 1.0, %v426_v38 }
 0x1a8   : > { %v428_v42 = vmul.f32 %v644_v36, %v427_v39 }
 0x1aa   : > { %v429_v44 = vadd.f32 %v644_v36, %v428_v42 }
 0x1ac   : > { %v433_v47 = vsel %vm432_vm6, %v644_v36, %v429_v44 }
 0x1ad   : > { %v438_v48 = vsel %vm435_vm7, %v437_v45, %v433_v47 }
 0x1ae   : > { %v439_v49 = vmul.f32 %v438_v48, %v414_v46 }
 0x1b0   : > { %v565_v50 = vclamps-f32 %v439_v49, 1.0 }
 0x1b2   : > { %v442_v52 = vadd.f32 1.0, %v565_v50 }
 0x1b4   : > { %v443_v53 = vmul.f32 %v442_v52, %v400_v51 }
 0x1b6   : > { %v444_v54 = vadd.f32 %v443_v53, %v958_v16 }
 0x1b8   : > { %v445_v55 = vmul.f32 0.7072136, %v444_v54 }
 0x1ba   : > { %446 = vst [vmem:[%s274_s28] sm:$0xff] %v445_v55 }
 0x1bb   : > { %762 = shalt.err (!%p759_p9)
}
 0x1bc   : > { %580 = dma.vmem_to_hbm [thread:$0]  (%p910_p4), %s461_s29, 128, %s463_s30, %s448_s25  }
 0x1bd PF: > { %s474_s22 = sand.u32 1, %s793_s18   ;;  %p1015_p10 = scmp.ge.s32.totalorder %s805_s21, 2 }
 0x1be   : > { %s475_s9 = scalar_lea.sflag [#allocation4], %s474_s22 }
 0x1bf   : > { %p594_p13 = pnand %p1015_p10, %p914_p6 }
 0x1c1   : > { %p595_p11 = pneg %p594_p13 }
 0x1c3   : > { %788 = dma.done.wait (%p595_p11), %s475_s9, 128  }
 0x1c4   : > { %790 = vsyncadd (%p595_p11), %s475_s9, 4294967168  ;;  %p19_p0 = scmp.ge.s32.totalorder %s884_s12, 4   ;;  %s1016_s18 = smov %s797_s19 }
 0x1c5   : > { %s1017_s19 = smov %s801_s20  ;;  %s1018_s20 = smov %s895_s15 }
 0x1c6   : > { %s1019_s21 = smov %s884_s12  ;;  %21 = sbr.rel (!%p19_p0) target bundleno = 6 (0x6), region = 93 }
 0x1cb   :  { %481 = vsyncpa [#allocation3], 1 }
 0x1cc   :  { %483 = vsyncpa [#allocation3 + $0x1], 1 }
 0x1cd   :  { %484 = vsyncpa [#allocation6], 1 }
 0x1ce   :  { %485 = vsyncpa [#allocation4], 1 }
 0x1cf   :  { %487 = vsyncpa [#allocation4 + $0x1], 1 }

// kernel: tpu_custom_call.1
= control target key start
LH: loop header
LB: loop body
LE: loop exit
PB: predicated region body
PF: predicated region fallthrough
CT: control target
= control target key end

     0   :  { %10 = vsyncpa [#allocation3], 0  ;;  %s1003_s0 = inlined_call_operand.hbm [shape: f32[16,128], index: 0, kind: input, shape index: {}]   ;;  %s1004_s1 = inlined_call_operand.hbm [shape: f32[128,128], index: 1, kind: input, shape index: {}]   ;;  %s1005_s2 = inlined_call_operand.vmem [shape: f32[1,128], index: 2, kind: input, shape index: {}]   ;;  %s1006_s3 = inlined_call_operand.hbm [shape: f32[128,128], index: 3, kind: input, shape index: {}]   ;;  %s1007_s4 = inlined_call_operand.vmem [shape: f32[1,128], index: 4, kind: input, shape index: {}]   ;;  %s1008_s5 = inlined_call_operand.hbm [shape: f32[16,128], index: 5, kind: output, shape index: {}]  }
   0x1   :  { %12 = vsyncpa [#allocation3 + $0x1], 0 }
   0x2   :  { %13 = vsyncpa [#allocation6], 0 }
   0x3   :  { %14 = vsyncpa [#allocation4], 0 }
   0x4   :  { %16 = vsyncpa [#allocation4 + $0x1], 0  ;;  %s841_s18 = smov 0   ;;  %s843_s19 = smov 0  }
   0x5   :  { %s845_s20 = smov 0   ;;  %s847_s21 = smov 0  }
   0x6 LB: > { %s174_s24 = sshll.u32 %s1004_s1, 4  ;;  %s865_s25 = sadd.s32 4294967295, %s805_s21   ;;  %s805_s21 = sphi %s847_s21, %s1019_s21   ;;  %s801_s20 = sphi %s845_s20, %s1018_s20   ;;  %s797_s19 = sphi %s843_s19, %s1017_s19   ;;  %s793_s18 = sphi %s841_s18, %s1016_s18   ;;  %s175_s24 = int_to_ptr.hbm [resolvable:$true] %s174_s24 }
   0x7   : > { %p553_p0 = scmp.ge.s32.totalorder %s805_s21, 1  ;;  %p43_p1 = scmp.eq.s32.totalorder %s865_s25, 0 }
   0x8   : > { %p163_p2 = scmp.lt.s32.totalorder %s805_s21, 3  ;;  %s807_s27 = smov [#allocation5]  }
   0x9   : > { %s176_s28 = sshll.u32 %s807_s27, 4  ;;  %s191_s6 = sshll.u32 %s1006_s3, 4  ;;  %s177_s28 = int_to_ptr.vmem [resolvable:$true] %s176_s28  ;;  %s192_s6 = int_to_ptr.hbm [resolvable:$true] %s191_s6 }
   0xa   : > { %p870_p3 = pnand %p553_p0, %p163_p2  ;;  %s808_s7 = smov [#allocation7]  }
   0xb   : > { %s193_s8 = sshll.u32 %s808_s7, 4  ;;  %s809_s9 = smov 128   ;;  %s194_s8 = int_to_ptr.vmem [resolvable:$true] %s193_s8 }
   0xc   : > { %p582_p4 = pneg %p870_p3  ;;  %s810_s10 = smov 8  }
   0xd   : > { %s552_s11 = sadd.s32 4294967294, %s805_s21   ;;  %s884_s12 = sadd.s32 1, %s805_s21  }
   0xe   : > { %p583_p6 = pnand %p582_p4, %p43_p1  ;;  %s26_s13 = ssub.s32 %s805_s21, %s884_s12 }
   0xf   : > { %s29_s14 = sadd.s32 1, %s801_s20  ;;  %p27_p7 = scmp.eq.s32.totalorder %s26_s13, 0 }
  0x10   : > { %585 = dma.hbm_to_vmem [thread:$0]  (!%p583_p6), %s175_s24, 2048, %s177_s28, [#allocation6], %s809_s9, %s809_s9, %s810_s10  }
  0x11   : > { %588 = dma.hbm_to_vmem [thread:$0]  (!%p583_p6), %s192_s6, 2048, %s194_s8, [#allocation6], %s809_s9, %s809_s9, %s810_s10  }
  0x12   : > { %p36_p8 = scmp.ne.s32.totalorder %s801_s20, %s797_s19  ;;  %p37_p9 = scmp.eq.s32.totalorder %s805_s21, 0 }
  0x13   : > { %p42_p10 = scmp.ne.s32.totalorder %s797_s19, %s793_s18  ;;  %p150_p13 = scmp.eq.s32.totalorder %s865_s25, 1 }
  0x14   : > { %s895_s15 = scalar_select %p27_p7, %s801_s20, %s29_s14  }
  0x15   : > { %p897_p11 = por %p37_p9, %p36_p8  ;;  %p903_p12 = por %p43_p1, %p42_p10 }
  0x16   : > { %p156_p0 = scmp.eq.s32.totalorder %s552_s11, 1  ;;  %p599_p2 = scmp.lt.s32.totalorder %s805_s21, 2 }
  0x17   : > { %s210_s22 = sand.u32 1, %s801_s20   ;;  %p910_p4 = por %p150_p13, %p36_p8 }
  0x18   : > { %p914_p6 = por %p156_p0, %p42_p10  ;;  %s557_s27 = sshll.u32 %s210_s22, 3 }
  0x19   : > { %s558_s28 = sshll.u32 %s805_s21, 3  ;;  %s214_s7 = scalar_lea.vmem [#allocation2], %s557_s27 }
  0x1a   : > { %s218_s6 = scalar_lea.hbm %s1003_s0, %s558_s28  ;;  %s222_s8 = sshll.u32 %s214_s7, 4  ;;  %s223_s8 = int_to_ptr.vmem [resolvable:$true] %s222_s8 }
  0x1b   : > { %s220_s9 = sshll.u32 %s218_s6, 4  ;;  %p924_p7 = pnand %p599_p2, %p897_p11  ;;  %s221_s9 = int_to_ptr.hbm [resolvable:$true] %s220_s9 }
  0x1c   : > { %s211_s11 = scalar_lea.sflag [#allocation3], %s210_s22  ;;  %s705_s13 = sshra.s32 %s221_s9, 4  ;;  %s706_s13 = int_to_ptr.hbm [resolvable:$true] %s705_s13 }
  0x1d   : > { %s707_s14 = scalar_lea.hbm %s706_s13, 8  ;;  %p709_p9 = pneg %p924_p7 }
  0x1e   : > { %p708_p8 = scmp.ne.s32.totalorder %s706_s13, %s707_s14  ;;  %s712_s29 = scalar_lea.hbm %s1003_s0, 16 }
  0x1f   : > { %p713_p11 = scmp.lt.s32.totalorder %s706_s13, %s1003_s0  ;;  %p714_p0 = scmp.lt.s32.totalorder %s712_s29, %s707_s14 }
  0x20   : > { %p710_p10 = pnand %p709_p9, %p708_p8 }
  0x21   : > { %p715_p2 = por %p714_p0, %p713_p11 }
  0x22   : > { %p711_p13 = pneg %p710_p10 }
  0x24   : > { %p716_p5 = pnand %p715_p2, %p711_p13 }
  0x26   : > { %719 = shalt.err (!%p716_p5)
}
  0x27   : > { %592 = dma.hbm_to_vmem [thread:$0]  (!%p924_p7), %s221_s9, 128, %s223_s8, %s211_s11  }
  0x28   : > { %231 = sbr.rel (%p870_p3) target bundleno = 445 (0x1bd), region = 40  ;;  %s941_s22 = sand.u32 (!%p870_p3), 1, %s797_s19  }
  0x29   : > { %s560_s6 = sshll.u32 (!%p870_p3), %s941_s22, 3  ;;  %s234_s7 = scalar_lea.sflag (!%p870_p3), [#allocation3], %s941_s22 }
  0x2a   : > { %s947_s13 = scalar_lea.vmem (!%p870_p3), [#allocation2], %s560_s6 }
  0x2d   : > { %780 = dma.done.wait (%p903_p12), %s234_s7, 128  }
  0x2e   : > { %782 = vsyncadd (%p903_p12), %s234_s7, 4294967168 }
  0x2f   : > { %784 = dma.done.wait (%p43_p1), [#allocation6], 4096  }
  0x30   : > { %786 = vsyncadd (%p43_p1), [#allocation6], 4294963200  ;;  %v291_v0 = vld [vmem:[#allocation5 + $0x78] sm:$0xff]  ;;  %v290_v1 = vld [vmem:[#allocation5 + $0x70] sm:$0xff]  ;;  %s567_s10 = sshll.u32 %s865_s25, 3  ;;  %s274_s28 = scalar_lea.vmem [#allocation8], %s560_s6 }
  0x31   : > { %296 = vmatpush.msra.mxu0 %v291_v0  ;;  %v289_v2 = vld [vmem:[#allocation5 + $0x68] sm:$0xff]  ;;  %v288_v3 = vld [vmem:[#allocation5 + $0x60] sm:$0xff]  ;;  %v287_v4 = vld [vmem:[#allocation5 + $0x58] sm:$0xff]  ;;  %s458_s27 = scalar_lea.hbm %s1008_s5, %s567_s10  ;;  %s460_s29 = sshll.u32 %s274_s28, 4  ;;  %s461_s29 = int_to_ptr.vmem [resolvable:$true] %s460_s29 }
  0x32   : > { %v286_v5 = vld [vmem:[#allocation5 + $0x50] sm:$0xff]  ;;  %v285_v6 = vld [vmem:[#allocation5 + $0x48] sm:$0xff]  ;;  %v284_v7 = vld [vmem:[#allocation5 + $0x40] sm:$0xff]  ;;  %s462_s30 = sshll.u32 %s458_s27, 4  ;;  %s448_s25 = scalar_lea.sflag [#allocation4], %s941_s22  ;;  %s463_s30 = int_to_ptr.hbm [resolvable:$true] %s462_s30 }
  0x33   : > { %297 = vmatpush.msra.mxu0 %v290_v1  ;;  %v283_v8 = vld [vmem:[#allocation5 + $0x38] sm:$0xff]  ;;  %v282_v9 = vld [vmem:[#allocation5 + $0x30] sm:$0xff]  ;;  %v281_v10 = vld [vmem:[#allocation5 + $0x28] sm:$0xff]  ;;  %s749_s16 = sshra.s32 %s463_s30, 4  ;;  %s755_s6 = scalar_lea.hbm %s1008_s5, 16  ;;  %s750_s16 = int_to_ptr.hbm [resolvable:$true] %s749_s16 }
  0x34   : > { %v280_v11 = vld [vmem:[#allocation5 + $0x20] sm:$0xff]  ;;  %v279_v12 = vld [vmem:[#allocation5 + $0x18] sm:$0xff]  ;;  %v278_v13 = vld [vmem:[#allocation5 + $0x10] sm:$0xff]  ;;  %s751_s7 = scalar_lea.hbm %s750_s16, 8  ;;  %p756_p12 = scmp.lt.s32.totalorder %s750_s16, %s1008_s5 }
  0x35   : > { %298 = vmatpush.msra.mxu0 %v289_v2  ;;  %v277_v14 = vld [vmem:[#allocation5 + $0x8] sm:$0xff]  ;;  %v276_v15 = vld [vmem:[#allocation5] sm:$0xff]  ;;  %v958_v16 = vld [vmem:[%s947_s13] sm:$0xff]  ;;  %p752_p1 = scmp.ne.s32.totalorder %s750_s16, %s751_s7  ;;  %p757_p7 = scmp.lt.s32.totalorder %s755_s6, %s751_s7 }
  0x36   : > { %v375_v17 = vld [vmem:[#allocation7 + $0x78] sm:$0xff]  ;;  %v374_v18 = vld [vmem:[#allocation7 + $0x70] sm:$0xff]  ;;  %v373_v19 = vld [vmem:[#allocation7 + $0x68] sm:$0xff] }
  0x37   : > { %299 = vmatpush.msra.mxu0 %v288_v3  ;;  %380 = vmatpush.msra.mxu1 %v375_v17  ;;  %v372_v20 = vld [vmem:[#allocation7 + $0x60] sm:$0xff]  ;;  %v639_v21 = vld [vmem:[%s1005_s2] ss:$0 sm:$0xff]  ;;  %v371_v22 = vld [vmem:[#allocation7 + $0x58] sm:$0xff]  ;;  %p753_p3 = pnand %p752_p1, %p910_p4  ;;  %p758_p8 = por %p757_p7, %p756_p12 }
  0x38   : > { %v370_v23 = vld [vmem:[#allocation7 + $0x50] sm:$0xff]  ;;  %v369_v25 = vld [vmem:[#allocation7 + $0x48] sm:$0xff]  ;;  %v368_v27 = vld [vmem:[#allocation7 + $0x40] sm:$0xff] }
  0x39   : > { %300 = vmatpush.msra.mxu0 %v287_v4  ;;  %381 = vmatpush.msra.mxu1 %v374_v18  ;;  %v367_v29 = vld [vmem:[#allocation7 + $0x38] sm:$0xff]  ;;  %v366_v31 = vld [vmem:[#allocation7 + $0x30] sm:$0xff]  ;;  %v365_v33 = vld [vmem:[#allocation7 + $0x28] sm:$0xff]  ;;  %p754_p5 = pneg %p753_p3 }
  0x3a   : > { %v364_v36 = vld [vmem:[#allocation7 + $0x20] sm:$0xff]  ;;  %v363_v39 = vld [vmem:[#allocation7 + $0x18] sm:$0xff]  ;;  %v362_v42 = vld [vmem:[#allocation7 + $0x10] sm:$0xff] }
  0x3b   : > { %301 = vmatpush.msra.mxu0 %v286_v5  ;;  %382 = vmatpush.msra.mxu1 %v373_v19  ;;  %v361_v45 = vld [vmem:[#allocation7 + $0x8] sm:$0xff]  ;;  %v360_v47 = vld [vmem:[#allocation7] sm:$0xff]  ;;  %p759_p9 = pnand %p758_p8, %p754_p5 }
  0x3d   : > { %302 = vmatpush.msra.mxu0 %v285_v6  ;;  %383 = vmatpush.msra.mxu1 %v372_v20 }
  0x3f   : > { %303 = vmatpush.msra.mxu0 %v284_v7  ;;  %384 = vmatpush.msra.mxu1 %v371_v22 }
  0x41   : > { %304 = vmatpush.msra.mxu0 %v283_v8  ;;  %385 = vmatpush.msra.mxu1 %v370_v23 }
  0x43   : > { %305 = vmatpush.msra.mxu0 %v282_v9  ;;  %386 = vmatpush.msra.mxu1 %v369_v25 }
  0x45   : > { %306 = vmatpush.msra.mxu0 %v281_v10  ;;  %387 = vmatpush.msra.mxu1 %v368_v27 }
  0x47   : > { %307 = vmatpush.msra.mxu0 %v280_v11  ;;  %388 = vmatpush.msra.mxu1 %v367_v29  ;;  %v640_v11 = vld [vmem:[%s1007_s4] ss:$0 sm:$0xff] }
  0x49   : > { %308 = vmatpush.msra.mxu0 %v279_v12  ;;  %389 = vmatpush.msra.mxu1 %v366_v31 }
  0x4b   : > { %309 = vmatpush.msra.mxu0 %v278_v13  ;;  %390 = vmatpush.msra.mxu1 %v365_v33 }
  0x4d   : > { %310 = vmatpush.msra.mxu0 %v277_v14  ;;  %391 = vmatpush.msra.mxu1 %v364_v36 }
  0x4f   : > { %311 = vmatpush.msra.mxu0 %v276_v15  ;;  %392 = vmatpush.msra.mxu1 %v363_v39 }
  0x50   : > { %312 = vmatmul.f32.vlgmr.msra.gmra.mxu0 %v958_v16 }
  0x51   : > { %393 = vmatpush.msra.mxu1 %v362_v42 }
  0x53   : > { %394 = vmatpush.msra.mxu1 %v361_v45 }
  0x55   : > { %395 = vmatpush.msra.mxu1 %v360_v47 }
  0xcd   : > { %v313_v24 = vpop.f32.mrf.mxu0 }
  0xce   : > { %v314_v26 = vadd.f32 %v639_v21, %v313_v24 }
  0xd0   : > { %v317_v28 = vmul.f32 0.70710677, %v314_v26  ;;  %v316_v8 = vmul.f32 0.5, %v314_v26 }
  0xd2   : > { %v318_v30 = vmul.f32 %v317_v28, %v317_v28 }
  0xd4   : > { %v319_v32 = vmin.f32 %v318_v30, 16.0 }
  0xd6   : > { %v320_v34 = vmul.f32 2.1237322e-06, %v319_v32  ;;  %v331_v35 = vmul.f32 3.8918573e-05, %v319_v32 }
  0xd8   : > { %v321_v37 = vadd.f32 0.00028619796, %v320_v34  ;;  %v332_v38 = vadd.f32 0.001143296, %v331_v35 }
  0xda   : > { %v322_v40 = vmul.f32 %v321_v37, %v319_v32  ;;  %v333_v41 = vmul.f32 %v332_v38, %v319_v32 }
  0xdc   : > { %v334_v43 = vadd.f32 0.014752088, %v333_v41  ;;  %v323_v44 = vadd.f32 0.0036580483, %v322_v40 }
  0xde   : > { %v335_v46 = vmul.f32 %v334_v43, %v319_v32  ;;  %v324_v49 = vmul.f32 %v323_v44, %v319_v32 }
  0xe0   : > { %v336_v48 = vadd.f32 0.112945676, %v335_v46  ;;  %v325_v52 = vadd.f32 0.05243302, %v324_v49 }
  0xe2   : > { %v337_v50 = vmul.f32 %v336_v48, %v319_v32  ;;  %v326_v55 = vmul.f32 %v325_v52, %v319_v32 }
  0xe4   : > { %v338_v51 = vadd.f32 0.4994258, %v337_v50  ;;  %v327_v56 = vadd.f32 0.18741608, %v326_v55 }
  0xe6   : > { %v339_v53 = vmul.f32 %v338_v51, %v319_v32  ;;  %v328_v58 = vmul.f32 %v327_v56, %v319_v32 }
  0xe8   : > { %v340_v54 = vadd.f32 1.0, %v339_v53  ;;  %v329_v62 = vadd.f32 1.1283791, %v328_v58 }
  0xea   : > { %641 = vrcp.f32 %v340_v54  ;;  %v352_v61 = vand.u32 2147483648, %v340_v54  ;;  %v350_v0 = vand.u32 2147483647, %v340_v54  ;;  %vm346_vm1 = vweird.f32 %v340_v54 }
  0xeb   : > { %v330_v3 = vmul.f32 %v329_v62, %v317_v28 }
  0xec   : > { %v353_v2 = vor.u32 1.1754944e-38, %v352_v61  ;;  %vm351_vm3 = vcmp.eq.f32.partialorder %v350_v0, 8.507059e+37 }
  0xf0   : > { %v642_v57 = vpop.eup %641 }
  0xf1   : > { %v342_v59 = vmul.f32 %v642_v57, %v340_v54  ;;  %vm347_vm0 = vweird.f32 %v642_v57 }
  0xf2   : > { %vm348_vm2 = vmor %vm346_vm1, %vm347_vm0 }
  0xf3   : > { %v343_v60 = vsub.f32 1.0, %v342_v59 }
  0xf5   : > { %v344_v63 = vmul.f32 %v642_v57, %v343_v60 }
  0xf7   : > { %v345_v1 = vadd.f32 %v642_v57, %v344_v63 }
  0xf9   : > { %v349_v4 = vsel %vm348_vm2, %v642_v57, %v345_v1 }
  0xfa   : > { %v354_v5 = vsel %vm351_vm3, %v353_v2, %v349_v4 }
  0xfb   : > { %v355_v6 = vmul.f32 %v354_v5, %v330_v3 }
  0xfd   : > { %v564_v7 = vclamps-f32 %v355_v6, 1.0 }
  0xff   : > { %v358_v9 = vadd.f32 1.0, %v564_v7 }
 0x101   : > { %v359_v10 = vmul.f32 %v358_v9, %v316_v8 }
 0x103   : > { %396 = vmatmul.f32.vlgmr.msra.gmra.mxu1 %v359_v10 }
 0x180   : > { %v397_v12 = vpop.f32.mrf.mxu1 }
 0x181   : > { %v398_v13 = vadd.f32 %v640_v11, %v397_v12 }
 0x183   : > { %v401_v14 = vmul.f32 0.70710677, %v398_v13  ;;  %v400_v51 = vmul.f32 0.5, %v398_v13 }
 0x185   : > { %v402_v15 = vmul.f32 %v401_v14, %v401_v14 }
 0x187   : > { %v403_v17 = vmin.f32 %v402_v15, 16.0 }
 0x189   : > { %v404_v18 = vmul.f32 2.1237322e-06, %v403_v17  ;;  %v415_v19 = vmul.f32 3.8918573e-05, %v403_v17 }
 0x18b   : > { %v405_v20 = vadd.f32 0.00028619796, %v404_v18  ;;  %v416_v21 = vadd.f32 0.001143296, %v415_v19 }
 0x18d   : > { %v406_v22 = vmul.f32 %v405_v20, %v403_v17  ;;  %v417_v23 = vmul.f32 %v416_v21, %v403_v17 }
 0x18f   : > { %v418_v24 = vadd.f32 0.014752088, %v417_v23  ;;  %v407_v25 = vadd.f32 0.0036580483, %v406_v22 }
 0x191   : > { %v419_v26 = vmul.f32 %v418_v24, %v403_v17  ;;  %v408_v28 = vmul.f32 %v407_v25, %v403_v17 }
 0x193   : > { %v420_v27 = vadd.f32 0.112945676, %v419_v26  ;;  %v409_v31 = vadd.f32 0.05243302, %v408_v28 }
 0x195   : > { %v421_v29 = vmul.f32 %v420_v27, %v403_v17  ;;  %v410_v34 = vmul.f32 %v409_v31, %v403_v17 }
 0x197   : > { %v422_v30 = vadd.f32 0.4994258, %v421_v29  ;;  %v411_v35 = vadd.f32 0.18741608, %v410_v34 }
 0x199   : > { %v423_v32 = vmul.f32 %v422_v30, %v403_v17  ;;  %v412_v37 = vmul.f32 %v411_v35, %v403_v17 }
 0x19b   : > { %v424_v33 = vadd.f32 1.0, %v423_v32  ;;  %v413_v41 = vadd.f32 1.1283791, %v412_v37 }
 0x19d   : > { %643 = vrcp.f32 %v424_v33  ;;  %v436_v40 = vand.u32 2147483648, %v424_v33  ;;  %v434_v43 = vand.u32 2147483647, %v424_v33  ;;  %vm430_vm5 = vweird.f32 %v424_v33 }
 0x19e   : > { %v414_v46 = vmul.f32 %v413_v41, %v401_v14 }
 0x19f   : > { %v437_v45 = vor.u32 1.1754944e-38, %v436_v40  ;;  %vm435_vm7 = vcmp.eq.f32.partialorder %v434_v43, 8.507059e+37 }
 0x1a3   : > { %v644_v36 = vpop.eup %643 }
 0x1a4   : > { %v426_v38 = vmul.f32 %v644_v36, %v424_v33  ;;  %vm431_vm4 = vweird.f32 %v644_v36 }
 0x1a5   : > { %vm432_vm6 = vmor %vm430_vm5, %vm431_vm4 }
 0x1a6   : > { %v427_v39 = vsub.f32 1.0, %v426_v38 }
 0x1a8   : > { %v428_v42 = vmul.f32 %v644_v36, %v427_v39 }
 0x1aa   : > { %v429_v44 = vadd.f32 %v644_v36, %v428_v42 }
 0x1ac   : > { %v433_v47 = vsel %vm432_vm6, %v644_v36, %v429_v44 }
 0x1ad   : > { %v438_v48 = vsel %vm435_vm7, %v437_v45, %v433_v47 }
 0x1ae   : > { %v439_v49 = vmul.f32 %v438_v48, %v414_v46 }
 0x1b0   : > { %v565_v50 = vclamps-f32 %v439_v49, 1.0 }
 0x1b2   : > { %v442_v52 = vadd.f32 1.0, %v565_v50 }
 0x1b4   : > { %v443_v53 = vmul.f32 %v442_v52, %v400_v51 }
 0x1b6   : > { %v444_v54 = vadd.f32 %v443_v53, %v958_v16 }
 0x1b8   : > { %v445_v55 = vmul.f32 0.7072136, %v444_v54 }
 0x1ba   : > { %446 = vst [vmem:[%s274_s28] sm:$0xff] %v445_v55 }
 0x1bb   : > { %762 = shalt.err (!%p759_p9)
}
 0x1bc   : > { %580 = dma.vmem_to_hbm [thread:$0]  (%p910_p4), %s461_s29, 128, %s463_s30, %s448_s25  }
 0x1bd PF: > { %s474_s22 = sand.u32 1, %s793_s18   ;;  %p1015_p10 = scmp.ge.s32.totalorder %s805_s21, 2 }
 0x1be   : > { %s475_s9 = scalar_lea.sflag [#allocation4], %s474_s22 }
 0x1bf   : > { %p594_p13 = pnand %p1015_p10, %p914_p6 }
 0x1c1   : > { %p595_p11 = pneg %p594_p13 }
 0x1c3   : > { %788 = dma.done.wait (%p595_p11), %s475_s9, 128  }
 0x1c4   : > { %790 = vsyncadd (%p595_p11), %s475_s9, 4294967168  ;;  %p19_p0 = scmp.ge.s32.totalorder %s884_s12, 4   ;;  %s1016_s18 = smov %s797_s19 }
 0x1c5   : > { %s1017_s19 = smov %s801_s20  ;;  %s1018_s20 = smov %s895_s15 }
 0x1c6   : > { %s1019_s21 = smov %s884_s12  ;;  %21 = sbr.rel (!%p19_p0) target bundleno = 6 (0x6), region = 93 }
 0x1cb   :  { %481 = vsyncpa [#allocation3], 1 }
 0x1cc   :  { %483 = vsyncpa [#allocation3 + $0x1], 1 }
 0x1cd   :  { %484 = vsyncpa [#allocation6], 1 }
 0x1ce   :  { %485 = vsyncpa [#allocation4], 1 }
 0x1cf   :  { %487 = vsyncpa [#allocation4 + $0x1], 1 }

</bundles_post_ra>
